<compile_context>
chip_gen: v6e
topology: v6e:2x2x1
jax: 0.10.0
libtpu: 0.0.40
codegen_flags: <defaults>
</compile_context>

<pallas_src>
import functools
import math

import jax
import jax.numpy as jnp
from jax import lax
from jax.experimental import pallas as pl
from jax.experimental.pallas import tpu as pltpu


# ----------------------------- helpers ---------------------------------------


def _round_up(a, m):
    return (a + m - 1) // m * m


def _splitmix32_py(x):
    """Python-side splitmix32 finalizer (used to pre-mix the static seed)."""
    x &= 0xFFFFFFFF
    x ^= x >> 16
    x = (x * 0x7FEB352D) & 0xFFFFFFFF
    x ^= x >> 15
    x = (x * 0x846CA68B) & 0xFFFFFFFF
    x ^= x >> 16
    return x


def _hash_u32(x):
    """splitmix32 finalizer on a uint32 tensor — all plain VPU integer ops."""
    x = x ^ (x >> 16)
    x = x * jnp.uint32(0x7FEB352D)
    x = x ^ (x >> 15)
    x = x * jnp.uint32(0x846CA68B)
    x = x ^ (x >> 16)
    return x


def _broadcast_pe_lanes(pe, batch):
    # pe: (ts, D) -> (ts, batch*D).  The x block is the row-major flattening of
    # (ts, B, D), so `batch` back-to-back copies of pe along the lane axis line
    # up with the batch-major flattened layout.
    if batch == 1:
        return pe
    return jnp.concatenate([pe] * batch, axis=-1)


# ----------------------------- kernels ---------------------------------------


def _pe_add_kernel(x_ref, pe_ref, o_ref, *, batch):
    # x_ref: (ts, B*D); pe_ref: (ts, D) broadcast over batch along lanes.
    pe = _broadcast_pe_lanes(pe_ref[...], batch)
    o_ref[...] = (x_ref[...] + pe).astype(o_ref.dtype)


def _pe_add_dropout_kernel(x_ref, pe_ref, o_ref, *, batch, seq_tile,
                           threshold, scale, seed_hash):
    # Train-mode path: add positional encoding, then inverted dropout with
    # keep-prob (1 - p).  Random bits come from a counter-based hash of the
    # global element index (portable: lowers on Mosaic and in interpret mode).
    y = x_ref[...] + _broadcast_pe_lanes(pe_ref[...], batch)
    ts, bd = y.shape
    row = lax.broadcasted_iota(jnp.int32, (ts, bd), 0).astype(jnp.uint32)
    col = lax.broadcasted_iota(jnp.int32, (ts, bd), 1).astype(jnp.uint32)
    g_row = pl.program_id(0).astype(jnp.uint32) * jnp.uint32(seq_tile) + row
    base = g_row * jnp.uint32(bd) + col              # global element index
    u = _hash_u32(base ^ jnp.uint32(seed_hash))      # uniform uint32 bits
    keep = u >= jnp.uint32(threshold)                # P(keep) = 1 - p
    scaled = y * jnp.asarray(scale, y.dtype)         # scale in x's dtype (bf16-safe)
    o_ref[...] = jnp.where(keep, scaled, jnp.zeros_like(scaled)).astype(o_ref.dtype)


# --------------------------- parameter init ----------------------------------


def make_positional_encoding_table(d_model, max_len=5000, dtype=jnp.float32):
    """Deterministic sin/cos table, identical to the PyTorch __init__."""
    position = jnp.arange(max_len, dtype=jnp.float32)[:, None]           # (L, 1)
    div_term = jnp.exp(
        jnp.arange(0, d_model, 2, dtype=jnp.float32) * (-math.log(10000.0) / d_model)
    )                                                                     # (D/2,)
    ang = position * div_term                                             # (L, D/2)
    pe = jnp.zeros((max_len, d_model), dtype=jnp.float32)
    pe = pe.at[:, 0::2].set(jnp.sin(ang))
    pe = pe.at[:, 1::2].set(jnp.cos(ang))
    # unsqueeze(0).transpose(0, 1) -> (max_len, 1, d_model)
    return pe[:, None, :].astype(dtype)


# ------------------------------ tiling ---------------------------------------


def _default_seq_tile(S, BD, dtype):
    """Seq tile so each padded 2D (ts, BD) x tile is ~4 MiB of VMEM.

    With double-buffered x-in + out (+ the small pe tile) that is ~16-18 MiB
    live, safely inside the 32 MiB scoped-VMEM limit on v5e/v6e and on v7x
    (which only has 64 MiB physical per TC).  Guarantees >= 2 grid steps when
    S is large enough so the "parallel" axis can use both v7x TensorCores.
    """
    itemsize = jnp.dtype(dtype).itemsize
    padded_row = _round_up(BD, 128) * itemsize        # lane-dense 2D layout
    target = 4 * 1024 * 1024
    ts = max(8, (target // max(padded_row, 1)) // 8 * 8)
    if ts >= S:
        if S >= 16:
            ts = _round_up(-(-S // 2), 8)             # >= 2 grid steps
        else:
            ts = S
    return int(min(ts, S))


# ------------------------------ wrapper --------------------------------------


def positional_encoding_forward(x, pe, *, dropout_p=0.1, train=False, seed=0,
                                seq_tile=None):
    """x: (S, B, D) float; pe: (max_len, 1, D). Returns (S, B, D).

    Aliases x to the output; donate x (jax.jit donate_argnums) at the call site
    to avoid a defensive HBM copy, and do not read x after the call.
    """
    S, B, D = x.shape
    BD = B * D
    # pe[:x.size(0), :], squeezed to a dense 2D (S, D) table in x's dtype so the
    # pe tile is (8,128)-friendly and the add does not promote bf16 -> f32.
    pe_2d = pe[:S, 0, :].astype(x.dtype)
    # Lane-dense, fully contiguous 2D view of x (free, row-major bitcast).
    x_2d = x.reshape(S, BD)

    if seq_tile is None:
        ts = _default_seq_tile(S, BD, x.dtype)
    else:
        ts = int(seq_tile)
        if ts >= S:
            ts = S
        else:
            # 2D blocks: sublane dim must be a multiple of 8 (or the full S).
            ts = min(max(8, (ts // 8) * 8), S)
    grid = (pl.cdiv(S, ts),)            # partial tail block is masked by Pallas

    itemsize = jnp.dtype(x.dtype).itemsize
    cost = pl.CostEstimate(
        flops=S * BD,
        transcendentals=0,
        bytes_accessed=2 * S * BD * itemsize + S * D * itemsize,
    )
    compiler_params = pltpu.CompilerParams(
        dimension_semantics=("parallel",),            # megacore on v7x
        vmem_limit_bytes=32 * 1024 * 1024,            # safe on v5e/v6e/v7x
    )

    x_spec = pl.BlockSpec((ts, BD), lambda i: (i, 0))
    pe_spec = pl.BlockSpec((ts, D), lambda i: (i, 0))
    out_spec = pl.BlockSpec((ts, BD), lambda i: (i, 0))

    if (not train) or dropout_p <= 0.0:
        # Eval-mode dropout is identity (PyTorch nn.Dropout.eval()).
        out2d = pl.pallas_call(
            functools.partial(_pe_add_kernel, batch=B),
            out_shape=jax.ShapeDtypeStruct((S, BD), x.dtype),
            grid=grid,
            in_specs=[x_spec, pe_spec],
            out_specs=out_spec,
            input_output_aliases={0: 0},              # x aliases the output
            compiler_params=compiler_params,
            cost_estimate=cost,
        )(x_2d, pe_2d)
        return out2d.reshape(S, B, D)

    if dropout_p >= 1.0:
        # PyTorch drops everything at p=1.
        return jnp.zeros_like(x)

    # TODO(synk): train-mode dropout matches torch.nn.Dropout only in
    # distribution (different RNG), not bit-for-bit.
    threshold = min(int(round(float(dropout_p) * 2.0 ** 32)), 2 ** 32 - 1)
    scale = 1.0 / (1.0 - float(dropout_p))
    kernel = functools.partial(
        _pe_add_dropout_kernel, batch=B, seq_tile=ts,
        threshold=threshold, scale=scale, seed_hash=_splitmix32_py(int(seed)))
    out2d = pl.pallas_call(
        kernel,
        out_shape=jax.ShapeDtypeStruct((S, BD), x.dtype),
        grid=grid,
        in_specs=[x_spec, pe_spec],
        out_specs=out_spec,
        input_output_aliases={0: 0},                  # x aliases the output
        compiler_params=compiler_params,
        cost_estimate=cost,
    )(x_2d, pe_2d)
    return out2d.reshape(S, B, D)


# -------------------------------- main ---------------------------------------


if __name__ == "__main__":
    S, B, D = 8, 2, 32            # seq_len, batch, d_model
    MAX_LEN = 64                  # small max_len (module default is 5000)
    P = 0.1

    key = jax.random.PRNGKey(0)
    x = jax.random.normal(key, (S, B, D), dtype=jnp.float32)

    pe = make_positional_encoding_table(D, max_len=MAX_LEN, dtype=jnp.float32)

    # Reference (eval mode: dropout is identity). Computed before the kernel
    # calls; x itself is not donated here so it stays valid across both calls.
    ref = x + pe[:S]

    # Eval path.
    out = positional_encoding_forward(x, pe, dropout_p=P, train=False)
    out = jax.block_until_ready(out)
    assert out.shape == (S, B, D)
    assert out.dtype == x.dtype
    assert jnp.allclose(out, ref, atol=1e-6, rtol=1e-6)

    # Train path (add + inverted dropout). Kept elements must equal ref / (1-p).
    out_t = positional_encoding_forward(x, pe, dropout_p=P, train=True, seed=123)
    out_t = jax.block_until_ready(out_t)
    assert out_t.shape == (S, B, D)
    assert out_t.dtype == x.dtype
    assert bool(jnp.all(jnp.isfinite(out_t)))
    kept = out_t != 0
    assert bool(jnp.allclose(jnp.where(kept, out_t, 0.0),
                             jnp.where(kept, ref / (1.0 - P), 0.0),
                             atol=1e-5, rtol=1e-5))
    # Sanity: at p=0.1 most elements are kept.
    assert 0.5 < float(jnp.mean(kept.astype(jnp.float32))) <= 1.0

    print("KERNEL_OK")
</pallas_src>

<mosaic_0001>
module attributes {stable_mosaic.version = 11 : i64} {
  func.func @_pe_add_kernel(%arg0: i32, %arg1: memref<8x64xf32, #tpu.memory_space<vmem>>, %arg2: memref<8x32xf32, #tpu.memory_space<vmem>>, %arg3: memref<8x64xf32, #tpu.memory_space<vmem>>) attributes {dimension_semantics = [#tpu.dimension_semantics<parallel>], iteration_bounds = array<i64: 1>, scalar_prefetch = 0 : i64, scratch_operands = 0 : i64, tpu.core_type = #tpu.core_type<tc>, window_params = [{transform_indices = @transform_0, window_bounds = array<i64: 8, 64>}, {transform_indices = @transform_1, window_bounds = array<i64: 8, 32>}, {transform_indices = @transform_2, window_bounds = array<i64: 8, 64>}]} {
    %c0 = arith.constant 0 : index
    %c0_0 = arith.constant 0 : index
    %0 = vector.load %arg2[%c0, %c0_0] : memref<8x32xf32, #tpu.memory_space<vmem>>, vector<8x32xf32>
    %1 = tpu.concatenate %0, %0 in 1 : vector<8x32xf32>, vector<8x32xf32> -> vector<8x64xf32>
    %c0_1 = arith.constant 0 : index
    %c0_2 = arith.constant 0 : index
    %2 = vector.load %arg1[%c0_1, %c0_2] : memref<8x64xf32, #tpu.memory_space<vmem>>, vector<8x64xf32>
    %3 = arith.addf %2, %1 : vector<8x64xf32>
    %c0_3 = arith.constant 0 : index
    %c0_4 = arith.constant 0 : index
    %4 = vector.load %arg3[%c0_3, %c0_4] : memref<8x64xf32, #tpu.memory_space<vmem>>, vector<8x64xf32>
    tpu.vector_store %arg3[%c0_3, %c0_4], %3 {strides = array<i32>} : memref<8x64xf32, #tpu.memory_space<vmem>>, vector<8x64xf32>,
    return
  }
  func.func @transform_0(%arg0: i32) -> (i32, i32) {
    %c0_i32 = arith.constant 0 : i32
    %c0_i32_0 = arith.constant 0 : i32
    return %arg0, %c0_i32 : i32, i32
  }
  func.func @transform_1(%arg0: i32) -> (i32, i32) {
    %c0_i32 = arith.constant 0 : i32
    %c0_i32_0 = arith.constant 0 : i32
    return %arg0, %c0_i32 : i32, i32
  }
  func.func @transform_2(%arg0: i32) -> (i32, i32) {
    %c0_i32 = arith.constant 0 : i32
    %c0_i32_0 = arith.constant 0 : i32
    return %arg0, %c0_i32 : i32, i32
  }
}

</mosaic_0001>

<bundles_post_ra>
// kernel: tpu_custom_call.1
= control target key start
LH: loop header
LB: loop body
LE: loop exit
PB: predicated region body
PF: predicated region fallthrough
CT: control target
= control target key end

     0   :  { %7 = vsyncpa [#allocation3], 0  ;;  %s124_s0 = inlined_call_operand.hbm [shape: f32[8,64], index: 0, kind: input, shape index: {}, may-alias: {0,2}]   ;;  %s125_s1 = inlined_call_operand.vmem [shape: f32[8,32], index: 1, kind: input, shape index: {}]   ;;  %s126_s2 = inlined_call_operand.hbm [shape: f32[8,64], index: 2, kind: output, shape index: {}, may-alias: {0,2}]  }
   0x1   :  { %8 = vsyncpa [#allocation4], 0  ;;  %s97_s9 = smov [#allocation2]  }
   0x2   :  { %s15_s10 = sshll.u32 %s97_s9, 4  ;;  %s16_s10 = int_to_ptr.vmem [resolvable:$true] %s15_s10 }
   0x3   :  { %s61_s11 = scalar_lea.vmem %s16_s10, 128  ;;  %p66_p1 = scmp.lt.s32.totalorder %s16_s10, %s16_s10 }
   0x4   :  { %p62_p0 = scmp.ne.s32.totalorder %s16_s10, %s61_s11  ;;  %p67_p2 = scmp.lt.s32.totalorder %s61_s11, %s61_s11 }
   0x6   :  { %p68_p3 = por %p67_p2, %p66_p1 }
   0x8   :  { %p69_p4 = pnand %p68_p3, %p62_p0 }
   0xa   :  { %72 = shalt.err (!%p69_p4)
}
   0xb   :  { %18 = dma.hbm_to_vmem [thread:$0]  %s124_s0, 128, %s16_s10, [#allocation3]  }
   0xc   :  { %93 = dma.done.wait [#allocation3], 128  }
   0xd   :  { %94 = vsyncadd [#allocation3], 4294967168  ;;  %v24_v0 = vld [vmem:[%s125_s1] sm:$0xff]  ;;  %s98_s16 = smov 32   ;;  %vm29_vm0 = vcmask 261120   ;;  %s99_s17 = smov [#allocation5]  }
   0xe   :  { %26 = vrot.lane.b32.xlu0 %v24_v0, %s98_s16  ;;  %v31_v1 = vld [vmem:[#allocation2] sm:$0xff]  ;;  %s41_s18 = sshll.u32 %s99_s17, 4  ;;  %vm33_vm1 = vcmask 523264   ;;  %s42_s18 = int_to_ptr.vmem [resolvable:$true] %s41_s18 }
   0xf   :  { %s73_s19 = scalar_lea.vmem %s42_s18, 128  ;;  %p78_p6 = scmp.lt.s32.totalorder %s42_s18, %s42_s18 }
  0x10   :  { %p74_p5 = scmp.ne.s32.totalorder %s42_s18, %s73_s19  ;;  %p79_p7 = scmp.lt.s32.totalorder %s73_s19, %s73_s19 }
  0x12   :  { %p80_p8 = por %p79_p7, %p78_p6 }
  0x14   :  { %p81_p9 = pnand %p80_p8, %p74_p5 }
  0x80   :  { %v27_v2 = vpop.permute.xlu0 %26 }
  0x81   :  { %v30_v3 = vsel %vm29_vm0, %v24_v0, %v27_v2 }
  0x82   :  { %v32_v4 = vadd.f32 %v31_v1, %v30_v3 }
  0x84   :  { %34 = vst.msk [vmem:[#allocation5] sm:$0xff] %vm33_vm1, %v32_v4 }
  0x85   :  { %84 = shalt.err (!%p81_p9)
}
  0x86   :  { %44 = dma.vmem_to_hbm [thread:$0]  %s42_s18, 128, %s126_s2, [#allocation4]  }
  0x87   :  { %95 = dma.done.wait [#allocation4], 128  }
  0x88   :  { %96 = vsyncadd [#allocation4], 4294967168 }
  0x89   :  { %48 = vsyncpa [#allocation3], 1 }
  0x8a   :  { %49 = vsyncpa [#allocation4], 1 }

</bundles_post_ra>
